<compile_context>
chip_gen: v7x
topology: tpu7x:2x2x1
jax: 0.10.0
libtpu: 0.0.40
codegen_flags: <defaults>
</compile_context>

<pallas_src>
import math

import jax
import jax.numpy as jnp
from jax import lax
from jax.experimental import pallas as pl
from jax.experimental.pallas import tpu as pltpu

EPS = 1e-5
_LANES = 128


# --------------------------------------------------------------------------
# Kernel helpers
# --------------------------------------------------------------------------
def _conv3x3_into(a3, m_ref, b_row, z_ref):
    """3x3 'same' conv of a block of images in lane-dense rows layout.

    a3    : (B, H, W*Cin)  f32 activation rows (channel-minor along lanes)
    m_ref : (3, W*Cin, W*Cout) block-Toeplitz weight slabs (one per ky tap;
            kx shifts and the W-boundary zero padding are folded in)
    b_row : (1, W*Cout)    conv bias broadcast over W
    z_ref : (B, H, W*Cout) output ref; the ky (row) shifts are realized by
            slice-accumulating into the ref -- no concat-with-zero-row
            temporaries, no padded scratch, no memsets.
    Returns the completed (B, H, W*Cout) conv result (read back from z_ref).
    """
    B, H, WCin = a3.shape
    WCout = m_ref.shape[-1]
    a2 = a3.reshape(B * H, WCin)
    # One lane-dense matmul per ky tap: M = B*H, K = W*Cin, N = W*Cout.
    y0 = jnp.dot(a2, m_ref[0], preferred_element_type=jnp.float32).reshape(B, H, WCout)
    y1 = jnp.dot(a2, m_ref[1], preferred_element_type=jnp.float32).reshape(B, H, WCout)
    y2 = jnp.dot(a2, m_ref[2], preferred_element_type=jnp.float32).reshape(B, H, WCout)
    # out[:, h] = y1[:, h] + y0[:, h-1] + y2[:, h+1]   (zero rows outside)
    z_ref[...] = y1 + b_row
    z_ref[:, 1:, :] += y0[:, :H - 1, :]
    z_ref[:, :H - 1, :] += y2[:, 1:, :]
    return z_ref[...]


def _partial_stats(z):
    """Per-block partial stats over (B, H): (2, W*Cout) = [sum ; sum-of-squares]."""
    z2 = z.reshape(-1, z.shape[-1])
    return jnp.concatenate(
        [jnp.sum(z2, axis=0, keepdims=True),
         jnp.sum(z2 * z2, axis=0, keepdims=True)], axis=0)


def conv1_stats_kernel(x_ref, m_ref, b_ref, z_ref, s_ref):
    # x_ref: (B, H, W*Cin)  m_ref: (3, W*Cin, W*Cout)  b_ref: (1, W*Cout)
    # z_ref: (B, H, W*Cout) s_ref: (1, 2, W*Cout)
    z = _conv3x3_into(x_ref[...].astype(jnp.float32), m_ref, b_ref[...], z_ref)
    s_ref[0] = _partial_stats(z)


def bn_relu_conv_stats_kernel(z1_ref, sc_ref, sh_ref, m_ref, b_ref,
                              z2_ref, s_ref):
    # BN1 (precomputed per-channel scale/shift, broadcast over W) + ReLU,
    # then conv2 and partial stats for BN2.
    a = jnp.maximum(z1_ref[...] * sc_ref[...] + sh_ref[...], 0.0)
    z2 = _conv3x3_into(a, m_ref, b_ref[...], z2_ref)
    s_ref[0] = _partial_stats(z2)


# --------------------------------------------------------------------------
# Wrapper
# --------------------------------------------------------------------------
def _toeplitz_slabs(w_hwio, W):
    """(3, 3, cin, cout) HWIO kernel -> (3, W*cin, W*cout) matmul slabs.

    slab[ky][wi*cin + ci, wo*cout + co] = w[ky, kx, ci, co] with wi = wo+kx-1;
    taps falling outside [0, W) are absent, realizing 'same' padding along W.
    """
    # TODO(synk): at realistic W/C, band the block-Toeplitz slabs over W (the
    # dense form wastes ~W/3x MXU FLOPs and grows VMEM quadratically in W) and
    # cast matmul operands to bf16 with f32 accumulation.
    _, _, cin, cout = w_hwio.shape
    slabs = []
    for ky in range(3):
        m = jnp.zeros((W, cin, W, cout), jnp.float32)
        for kx in range(3):
            s = jnp.eye(W, W, k=1 - kx, dtype=jnp.float32)
            m = m + s[:, None, :, None] * w_hwio[ky, kx][None, :, None, :]
        slabs.append(m.reshape(W * cin, W * cout))
    return jnp.stack(slabs, axis=0)


def _bn_fold(ssum, ssq, count, gamma, beta):
    """Fold train-mode BN (biased batch var) into per-channel scale/shift."""
    # TODO(synk): for very large N*H*W replace the E[x^2]-mean^2 combine with a
    # centered / Welford-style cross-block reduction (cancellation risk).
    mean = ssum / count
    var = ssq / count - mean * mean
    scale = gamma * lax.rsqrt(var + EPS)
    shift = beta - mean * scale
    return scale, shift


def _pad_channels(c, W):
    """Smallest c' >= c such that (W * c') % 128 == 0 (lane-dense rows)."""
    mult = _LANES // math.gcd(W, _LANES)
    return ((c + mult - 1) // mult) * mult


def _pick_image_block(N, H):
    """Images per grid step: aim for matmul M = B*H ~ 128 rows, but keep
    >= 2 grid steps whenever N >= 2 so both v7x TensorCores get work."""
    target = max(1, 128 // max(H, 1))
    B = min(target, N)
    while B > 1 and (N % B != 0 or N // B < 2):
        B -= 1
    return max(B, 1)


@jax.jit
def double_conv(x_nchw, params):
    """DoubleConv forward. x_nchw: (N, Cin, H, W) f32 -> (N, Cout, H, W)."""
    w1, b1, g1, be1, w2, b2, g2, be2 = params
    N, Cin, H, W = x_nchw.shape
    Cout = w1.shape[-1]

    # NCHW -> lane-dense rows (N, H, W*Cin_p); Cin zero-padded so the minor
    # dim is a multiple of 128 lanes.  Padded channels are zero in the input
    # rows AND in the slab rows, so conv outputs / BN stats are unchanged.
    # This transpose+pad+reshape is one fused XLA copy; the inverse relayout
    # on the output absorbs BN2+ReLU for free (no third Pallas pass).
    # TODO(synk): at realistic sizes accept/produce NHWC at the op boundary to
    # drop these relayout copies entirely.
    Cin_p = _pad_channels(Cin, W)
    WCin, WCout = W * Cin_p, W * Cout
    x_nhwc = jnp.transpose(x_nchw, (0, 2, 3, 1))
    if Cin_p != Cin:
        x_nhwc = jnp.pad(x_nhwc, ((0, 0), (0, 0), (0, 0), (0, Cin_p - Cin)))
        w1 = jnp.pad(w1, ((0, 0), (0, 0), (0, Cin_p - Cin), (0, 0)))
    x_rows = x_nhwc.reshape(N, H, WCin)

    m1 = _toeplitz_slabs(w1, W)              # (3, W*Cin_p, W*Cout)
    m2 = _toeplitz_slabs(w2, W)              # (3, W*Cout,  W*Cout)

    def tile_w(v):                           # (Cout,) -> (1, W*Cout) [w*Cout+c]
        return jnp.tile(v.reshape(1, Cout), (1, W))

    B = _pick_image_block(N, H)              # images per grid step
    G = N // B

    # Per-step footprint (blocks + double buffering) is < 1 MiB at this shape,
    # so 4 MiB of scoped VMEM is ample on v5e/v6e/v7x and leaves the rest for
    # the surrounding XLA fusions.
    cparams = pltpu.CompilerParams(
        dimension_semantics=("parallel",),   # megacore-shard over image blocks
        vmem_limit_bytes=4 * 1024 * 1024)
    # TODO(synk): at realistic H add an inner "arbitrary" row-band axis (with a
    # 1-row halo) so each v7x core pipelines multiple steps even at tiny N.

    row_in_spec = pl.BlockSpec((B, H, WCin), lambda n: (n, 0, 0))
    row_mid_spec = pl.BlockSpec((B, H, WCout), lambda n: (n, 0, 0))
    stat_spec = pl.BlockSpec((1, 2, WCout), lambda n: (n, 0, 0))
    vec_spec = pl.BlockSpec((1, WCout), lambda n: (0, 0))
    slab1_spec = pl.BlockSpec((3, WCin, WCout), lambda n: (0, 0, 0))
    slab2_spec = pl.BlockSpec((3, WCout, WCout), lambda n: (0, 0, 0))

    # ---- pass 1: conv1 + per-block partial batch stats ---------------------
    z1, s1 = pl.pallas_call(
        conv1_stats_kernel,
        out_shape=(jax.ShapeDtypeStruct((N, H, WCout), jnp.float32),
                   jax.ShapeDtypeStruct((G, 2, WCout), jnp.float32)),
        grid=(G,),
        in_specs=[row_in_spec, slab1_spec, vec_spec],
        out_specs=[row_mid_spec, stat_spec],
        compiler_params=cparams,
    )(x_rows, m1, tile_w(b1))

    count = float(N * H * W)
    s1r = s1.reshape(G, 2, W, Cout)
    scale1, shift1 = _bn_fold(jnp.sum(s1r[:, 0], axis=(0, 1)),
                              jnp.sum(s1r[:, 1], axis=(0, 1)),
                              count, g1, be1)

    # ---- pass 2: BN1 + ReLU + conv2 + partial batch stats -------------------
    z2, s2 = pl.pallas_call(
        bn_relu_conv_stats_kernel,
        out_shape=(jax.ShapeDtypeStruct((N, H, WCout), jnp.float32),
                   jax.ShapeDtypeStruct((G, 2, WCout), jnp.float32)),
        grid=(G,),
        in_specs=[row_mid_spec, vec_spec, vec_spec, slab2_spec, vec_spec],
        out_specs=[row_mid_spec, stat_spec],
        compiler_params=cparams,
    )(z1, tile_w(scale1), tile_w(shift1), m2, tile_w(b2))

    s2r = s2.reshape(G, 2, W, Cout)
    scale2, shift2 = _bn_fold(jnp.sum(s2r[:, 0], axis=(0, 1)),
                              jnp.sum(s2r[:, 1], axis=(0, 1)),
                              count, g2, be2)

    # ---- BN2 + ReLU: fused by XLA into the rows -> NCHW output relayout -----
    y_nhwc = jnp.maximum(z2.reshape(N, H, W, Cout) * scale2 + shift2, 0.0)
    return jnp.transpose(y_nhwc, (0, 3, 1, 2))


# --------------------------------------------------------------------------
# Pure-JAX reference (mirrors the PyTorch forward in training mode)
# --------------------------------------------------------------------------
def reference_double_conv(x_nchw, params):
    w1, b1, g1, be1, w2, b2, g2, be2 = params

    def conv_bn_relu(x, w_hwio, b, g, be):
        y = lax.conv_general_dilated(
            x, w_hwio, window_strides=(1, 1), padding="SAME",
            dimension_numbers=("NHWC", "HWIO", "NHWC"))
        y = y + b.reshape(1, 1, 1, -1)
        mean = jnp.mean(y, axis=(0, 1, 2))
        var = jnp.var(y, axis=(0, 1, 2))   # biased, like PyTorch BN normalization
        y = (y - mean) * lax.rsqrt(var + EPS) * g + be
        return jnp.maximum(y, 0.0)

    x = jnp.transpose(x_nchw, (0, 2, 3, 1))
    y = conv_bn_relu(x, w1, b1, g1, be1)
    y = conv_bn_relu(y, w2, b2, g2, be2)
    return jnp.transpose(y, (0, 3, 1, 2))


def init_params(key, in_ch, out_ch):
    ks = jax.random.split(key, 8)
    # Conv weights stored as HWIO (3, 3, Cin, Cout).
    w1 = jax.random.normal(ks[0], (3, 3, in_ch, out_ch), jnp.float32) * 0.1
    b1 = jax.random.normal(ks[1], (out_ch,), jnp.float32) * 0.05
    g1 = 1.0 + 0.1 * jax.random.normal(ks[2], (out_ch,), jnp.float32)
    be1 = 0.1 * jax.random.normal(ks[3], (out_ch,), jnp.float32)
    w2 = jax.random.normal(ks[4], (3, 3, out_ch, out_ch), jnp.float32) * 0.1
    b2 = jax.random.normal(ks[5], (out_ch,), jnp.float32) * 0.05
    g2 = 1.0 + 0.1 * jax.random.normal(ks[6], (out_ch,), jnp.float32)
    be2 = 0.1 * jax.random.normal(ks[7], (out_ch,), jnp.float32)
    return (w1, b1, g1, be1, w2, b2, g2, be2)


if __name__ == "__main__":
    key = jax.random.PRNGKey(0)
    k_x, k_p = jax.random.split(key)

    N, IN_CH, OUT_CH, H, W = 2, 4, 8, 16, 16
    x = jax.random.normal(k_x, (N, IN_CH, H, W), jnp.float32)
    params = init_params(k_p, IN_CH, OUT_CH)

    out = jax.block_until_ready(double_conv(x, params))
    ref = reference_double_conv(x, params)

    assert out.shape == (N, OUT_CH, H, W), out.shape
    max_err = float(jnp.max(jnp.abs(out - ref)))
    assert jnp.allclose(out, ref, atol=1e-4, rtol=1e-4), max_err

    print("KERNEL_OK")
</pallas_src>

<mosaic_0001>
module attributes {stable_mosaic.version = 11 : i64} {
  func.func @conv1_stats_kernel(%arg0: i32, %arg1: memref<1x16x128xf32, #tpu.memory_space<vmem>>, %arg2: memref<3x128x128xf32, #tpu.memory_space<vmem>>, %arg3: memref<1x128xf32, #tpu.memory_space<vmem>>, %arg4: memref<1x16x128xf32, #tpu.memory_space<vmem>>, %arg5: memref<1x2x128xf32, #tpu.memory_space<vmem>>) attributes {dimension_semantics = [#tpu.dimension_semantics<parallel>], iteration_bounds = array<i64: 2>, scalar_prefetch = 0 : i64, scratch_operands = 0 : i64, tpu.core_type = #tpu.core_type<tc>, window_params = [{transform_indices = @transform_0, window_bounds = array<i64: 1, 16, 128>}, {pipeline_mode = #tpu.pipeline_mode<synchronous>, transform_indices = @transform_1, window_bounds = array<i64: 3, 128, 128>}, {pipeline_mode = #tpu.pipeline_mode<synchronous>, transform_indices = @transform_2, window_bounds = array<i64: 1, 128>}, {transform_indices = @transform_3, window_bounds = array<i64: 1, 16, 128>}, {transform_indices = @transform_4, window_bounds = array<i64: 1, 2, 128>}]} {
    %c0 = arith.constant 0 : index
    %c0_0 = arith.constant 0 : index
    %c0_1 = arith.constant 0 : index
    %0 = vector.load %arg1[%c0, %c0_0, %c0_1] : memref<1x16x128xf32, #tpu.memory_space<vmem>>, vector<1x16x128xf32>
    %c0_2 = arith.constant 0 : index
    %c0_3 = arith.constant 0 : index
    %1 = vector.load %arg3[%c0_2, %c0_3] : memref<1x128xf32, #tpu.memory_space<vmem>>, vector<1x128xf32>
    %2 = vector.shape_cast %0 : vector<1x16x128xf32> to vector<16x128xf32>
    %c0_4 = arith.constant 0 : index
    %c0_5 = arith.constant 0 : index
    %c0_6 = arith.constant 0 : index
    %3 = vector.load %arg2[%c0_4, %c0_5, %c0_6] : memref<3x128x128xf32, #tpu.memory_space<vmem>>, vector<1x128x128xf32>
    %4 = vector.shape_cast %3 : vector<1x128x128xf32> to vector<128x128xf32>
    %cst = arith.constant dense<0.000000e+00> : vector<16x128xf32>
    %5 = tpu.matmul %2, %4, %cst {dimension_numbers = #tpu.dot_dimension_numbers<[1], [0], [0], [1], [0, 0, 1, 1], [], []>} : vector<16x128xf32>, vector<128x128xf32>, vector<16x128xf32> -> vector<16x128xf32>
    %6 = vector.shape_cast %5 : vector<16x128xf32> to vector<1x16x128xf32>
    %c1 = arith.constant 1 : index
    %c0_7 = arith.constant 0 : index
    %c0_8 = arith.constant 0 : index
    %7 = vector.load %arg2[%c1, %c0_7, %c0_8] : memref<3x128x128xf32, #tpu.memory_space<vmem>>, vector<1x128x128xf32>
    %8 = vector.shape_cast %7 : vector<1x128x128xf32> to vector<128x128xf32>
    %cst_9 = arith.constant dense<0.000000e+00> : vector<16x128xf32>
    %9 = tpu.matmul %2, %8, %cst_9 {dimension_numbers = #tpu.dot_dimension_numbers<[1], [0], [0], [1], [0, 0, 1, 1], [], []>} : vector<16x128xf32>, vector<128x128xf32>, vector<16x128xf32> -> vector<16x128xf32>
    %10 = vector.shape_cast %9 : vector<16x128xf32> to vector<1x16x128xf32>
    %c2 = arith.constant 2 : index
    %c0_10 = arith.constant 0 : index
    %c0_11 = arith.constant 0 : index
    %11 = vector.load %arg2[%c2, %c0_10, %c0_11] : memref<3x128x128xf32, #tpu.memory_space<vmem>>, vector<1x128x128xf32>
    %12 = vector.shape_cast %11 : vector<1x128x128xf32> to vector<128x128xf32>
    %cst_12 = arith.constant dense<0.000000e+00> : vector<16x128xf32>
    %13 = tpu.matmul %2, %12, %cst_12 {dimension_numbers = #tpu.dot_dimension_numbers<[1], [0], [0], [1], [0, 0, 1, 1], [], []>} : vector<16x128xf32>, vector<128x128xf32>, vector<16x128xf32> -> vector<16x128xf32>
    %14 = vector.shape_cast %13 : vector<16x128xf32> to vector<1x16x128xf32>
    %15 = vector.shape_cast %1 : vector<1x128xf32> to vector<1x1x128xf32>
    %16 = vector.broadcast %15 : vector<1x1x128xf32> to vector<1x16x128xf32>
    %17 = arith.addf %10, %16 : vector<1x16x128xf32>
    %c0_13 = arith.constant 0 : index
    %c0_14 = arith.constant 0 : index
    %c0_15 = arith.constant 0 : index
    %18 = vector.load %arg4[%c0_13, %c0_14, %c0_15] : memref<1x16x128xf32, #tpu.memory_space<vmem>>, vector<1x16x128xf32>
    tpu.vector_store %arg4[%c0_13, %c0_14, %c0_15], %17 {strides = array<i32>} : memref<1x16x128xf32, #tpu.memory_space<vmem>>, vector<1x16x128xf32>,
    %c0_16 = arith.constant 0 : index
    %c1_17 = arith.constant 1 : index
    %c0_18 = arith.constant 0 : index
    %19 = vector.load %arg4[%c0_16, %c1_17, %c0_18] : memref<1x16x128xf32, #tpu.memory_space<vmem>>, vector<1x15x128xf32>
    %20 = vector.extract_strided_slice %6 {offsets = [0, 0, 0], sizes = [1, 15, 128], strides = [1, 1, 1]} : vector<1x16x128xf32> to vector<1x15x128xf32>
    %21 = arith.addf %19, %20 : vector<1x15x128xf32>
    %c0_19 = arith.constant 0 : index
    %c1_20 = arith.constant 1 : index
    %c0_21 = arith.constant 0 : index
    %22 = vector.load %arg4[%c0_19, %c1_20, %c0_21] : memref<1x16x128xf32, #tpu.memory_space<vmem>>, vector<1x15x128xf32>
    tpu.vector_store %arg4[%c0_19, %c1_20, %c0_21], %21 {strides = array<i32>} : memref<1x16x128xf32, #tpu.memory_space<vmem>>, vector<1x15x128xf32>,
    %c0_22 = arith.constant 0 : index
    %c0_23 = arith.constant 0 : index
    %c0_24 = arith.constant 0 : index
    %23 = vector.load %arg4[%c0_22, %c0_23, %c0_24] : memref<1x16x128xf32, #tpu.memory_space<vmem>>, vector<1x15x128xf32>
    %24 = vector.extract_strided_slice %14 {offsets = [0, 1, 0], sizes = [1, 15, 128], strides = [1, 1, 1]} : vector<1x16x128xf32> to vector<1x15x128xf32>
    %25 = arith.addf %23, %24 : vector<1x15x128xf32>
    %c0_25 = arith.constant 0 : index
    %c0_26 = arith.constant 0 : index
    %c0_27 = arith.constant 0 : index
    %26 = vector.load %arg4[%c0_25, %c0_26, %c0_27] : memref<1x16x128xf32, #tpu.memory_space<vmem>>, vector<1x15x128xf32>
    tpu.vector_store %arg4[%c0_25, %c0_26, %c0_27], %25 {strides = array<i32>} : memref<1x16x128xf32, #tpu.memory_space<vmem>>, vector<1x15x128xf32>,
    %c0_28 = arith.constant 0 : index
    %c0_29 = arith.constant 0 : index
    %c0_30 = arith.constant 0 : index
    %27 = vector.load %arg4[%c0_28, %c0_29, %c0_30] : memref<1x16x128xf32, #tpu.memory_space<vmem>>, vector<1x16x128xf32>
    %28 = vector.shape_cast %27 : vector<1x16x128xf32> to vector<16x128xf32>
    %cst_31 = arith.constant dense<0.000000e+00> : vector<128xf32>
    %29 = vector.multi_reduction <add>, %28, %cst_31 [0] : vector<16x128xf32> to vector<128xf32>
    %30 = vector.shape_cast %29 : vector<128xf32> to vector<1x128xf32>
    %31 = arith.mulf %28, %28 : vector<16x128xf32>
    %cst_32 = arith.constant dense<0.000000e+00> : vector<128xf32>
    %32 = vector.multi_reduction <add>, %31, %cst_32 [0] : vector<16x128xf32> to vector<128xf32>
    %33 = vector.shape_cast %32 : vector<128xf32> to vector<1x128xf32>
    %34 = tpu.concatenate %30, %33 in 0 : vector<1x128xf32>, vector<1x128xf32> -> vector<2x128xf32>
    %c0_33 = arith.constant 0 : index
    %c0_34 = arith.constant 0 : index
    %c0_35 = arith.constant 0 : index
    %35 = vector.load %arg5[%c0_33, %c0_34, %c0_35] : memref<1x2x128xf32, #tpu.memory_space<vmem>>, vector<1x2x128xf32>
    %36 = vector.shape_cast %35 : vector<1x2x128xf32> to vector<2x128xf32>
    %37 = vector.shape_cast %34 : vector<2x128xf32> to vector<1x2x128xf32>
    tpu.vector_store %arg5[%c0_33, %c0_34, %c0_35], %37 {strides = array<i32>} : memref<1x2x128xf32, #tpu.memory_space<vmem>>, vector<1x2x128xf32>,
    return
  }
  func.func @transform_0(%arg0: i32) -> (i32, i32, i32) {
    %c0_i32 = arith.constant 0 : i32
    %c0_i32_0 = arith.constant 0 : i32
    %c0_i32_1 = arith.constant 0 : i32
    return %arg0, %c0_i32, %c0_i32_0 : i32, i32, i32
  }
  func.func @transform_1(%arg0: i32) -> (i32, i32, i32) {
    %c0_i32 = arith.constant 0 : i32
    %c0_i32_0 = arith.constant 0 : i32
    %c0_i32_1 = arith.constant 0 : i32
    %c0_i32_2 = arith.constant 0 : i32
    return %c0_i32, %c0_i32_0, %c0_i32_1 : i32, i32, i32
  }
  func.func @transform_2(%arg0: i32) -> (i32, i32) {
    %c0_i32 = arith.constant 0 : i32
    %c0_i32_0 = arith.constant 0 : i32
    %c0_i32_1 = arith.constant 0 : i32
    return %c0_i32, %c0_i32_0 : i32, i32
  }
  func.func @transform_3(%arg0: i32) -> (i32, i32, i32) {
    %c0_i32 = arith.constant 0 : i32
    %c0_i32_0 = arith.constant 0 : i32
    %c0_i32_1 = arith.constant 0 : i32
    return %arg0, %c0_i32, %c0_i32_0 : i32, i32, i32
  }
  func.func @transform_4(%arg0: i32) -> (i32, i32, i32) {
    %c0_i32 = arith.constant 0 : i32
    %c0_i32_0 = arith.constant 0 : i32
    %c0_i32_1 = arith.constant 0 : i32
    return %arg0, %c0_i32, %c0_i32_0 : i32, i32, i32
  }
}

module attributes {stable_mosaic.version = 11 : i64} {
  func.func @bn_relu_conv_stats_kernel(%arg0: i32, %arg1: memref<1x16x128xf32, #tpu.memory_space<vmem>>, %arg2: memref<1x128xf32, #tpu.memory_space<vmem>>, %arg3: memref<1x128xf32, #tpu.memory_space<vmem>>, %arg4: memref<3x128x128xf32, #tpu.memory_space<vmem>>, %arg5: memref<1x128xf32, #tpu.memory_space<vmem>>, %arg6: memref<1x16x128xf32, #tpu.memory_space<vmem>>, %arg7: memref<1x2x128xf32, #tpu.memory_space<vmem>>) attributes {dimension_semantics = [#tpu.dimension_semantics<parallel>], iteration_bounds = array<i64: 2>, scalar_prefetch = 0 : i64, scratch_operands = 0 : i64, tpu.core_type = #tpu.core_type<tc>, window_params = [{transform_indices = @transform_0, window_bounds = array<i64: 1, 16, 128>}, {pipeline_mode = #tpu.pipeline_mode<synchronous>, transform_indices = @transform_1, window_bounds = array<i64: 1, 128>}, {pipeline_mode = #tpu.pipeline_mode<synchronous>, transform_indices = @transform_2, window_bounds = array<i64: 1, 128>}, {pipeline_mode = #tpu.pipeline_mode<synchronous>, transform_indices = @transform_3, window_bounds = array<i64: 3, 128, 128>}, {pipeline_mode = #tpu.pipeline_mode<synchronous>, transform_indices = @transform_4, window_bounds = array<i64: 1, 128>}, {transform_indices = @transform_5, window_bounds = array<i64: 1, 16, 128>}, {transform_indices = @transform_6, window_bounds = array<i64: 1, 2, 128>}]} {
    %c0 = arith.constant 0 : index
    %c0_0 = arith.constant 0 : index
    %c0_1 = arith.constant 0 : index
    %0 = vector.load %arg1[%c0, %c0_0, %c0_1] : memref<1x16x128xf32, #tpu.memory_space<vmem>>, vector<1x16x128xf32>
    %c0_2 = arith.constant 0 : index
    %c0_3 = arith.constant 0 : index
    %1 = vector.load %arg2[%c0_2, %c0_3] : memref<1x128xf32, #tpu.memory_space<vmem>>, vector<1x128xf32>
    %2 = vector.shape_cast %1 : vector<1x128xf32> to vector<1x1x128xf32>
    %3 = vector.broadcast %2 : vector<1x1x128xf32> to vector<1x16x128xf32>
    %4 = arith.mulf %0, %3 : vector<1x16x128xf32>
    %c0_4 = arith.constant 0 : index
    %c0_5 = arith.constant 0 : index
    %5 = vector.load %arg3[%c0_4, %c0_5] : memref<1x128xf32, #tpu.memory_space<vmem>>, vector<1x128xf32>
    %6 = vector.shape_cast %5 : vector<1x128xf32> to vector<1x1x128xf32>
    %7 = vector.broadcast %6 : vector<1x1x128xf32> to vector<1x16x128xf32>
    %8 = arith.addf %4, %7 : vector<1x16x128xf32>
    %cst = arith.constant 0.000000e+00 : f32
    %9 = vector.broadcast %cst : f32 to vector<1x16x128xf32>
    %10 = arith.maximumf %8, %9 : vector<1x16x128xf32>
    %c0_6 = arith.constant 0 : index
    %c0_7 = arith.constant 0 : index
    %11 = vector.load %arg5[%c0_6, %c0_7] : memref<1x128xf32, #tpu.memory_space<vmem>>, vector<1x128xf32>
    %12 = vector.shape_cast %10 : vector<1x16x128xf32> to vector<16x128xf32>
    %c0_8 = arith.constant 0 : index
    %c0_9 = arith.constant 0 : index
    %c0_10 = arith.constant 0 : index
    %13 = vector.load %arg4[%c0_8, %c0_9, %c0_10] : memref<3x128x128xf32, #tpu.memory_space<vmem>>, vector<1x128x128xf32>
    %14 = vector.shape_cast %13 : vector<1x128x128xf32> to vector<128x128xf32>
    %cst_11 = arith.constant dense<0.000000e+00> : vector<16x128xf32>
    %15 = tpu.matmul %12, %14, %cst_11 {dimension_numbers = #tpu.dot_dimension_numbers<[1], [0], [0], [1], [0, 0, 1, 1], [], []>} : vector<16x128xf32>, vector<128x128xf32>, vector<16x128xf32> -> vector<16x128xf32>
    %16 = vector.shape_cast %15 : vector<16x128xf32> to vector<1x16x128xf32>
    %c1 = arith.constant 1 : index
    %c0_12 = arith.constant 0 : index
    %c0_13 = arith.constant 0 : index
    %17 = vector.load %arg4[%c1, %c0_12, %c0_13] : memref<3x128x128xf32, #tpu.memory_space<vmem>>, vector<1x128x128xf32>
    %18 = vector.shape_cast %17 : vector<1x128x128xf32> to vector<128x128xf32>
    %cst_14 = arith.constant dense<0.000000e+00> : vector<16x128xf32>
    %19 = tpu.matmul %12, %18, %cst_14 {dimension_numbers = #tpu.dot_dimension_numbers<[1], [0], [0], [1], [0, 0, 1, 1], [], []>} : vector<16x128xf32>, vector<128x128xf32>, vector<16x128xf32> -> vector<16x128xf32>
    %20 = vector.shape_cast %19 : vector<16x128xf32> to vector<1x16x128xf32>
    %c2 = arith.constant 2 : index
    %c0_15 = arith.constant 0 : index
    %c0_16 = arith.constant 0 : index
    %21 = vector.load %arg4[%c2, %c0_15, %c0_16] : memref<3x128x128xf32, #tpu.memory_space<vmem>>, vector<1x128x128xf32>
    %22 = vector.shape_cast %21 : vector<1x128x128xf32> to vector<128x128xf32>
    %cst_17 = arith.constant dense<0.000000e+00> : vector<16x128xf32>
    %23 = tpu.matmul %12, %22, %cst_17 {dimension_numbers = #tpu.dot_dimension_numbers<[1], [0], [0], [1], [0, 0, 1, 1], [], []>} : vector<16x128xf32>, vector<128x128xf32>, vector<16x128xf32> -> vector<16x128xf32>
    %24 = vector.shape_cast %23 : vector<16x128xf32> to vector<1x16x128xf32>
    %25 = vector.shape_cast %11 : vector<1x128xf32> to vector<1x1x128xf32>
    %26 = vector.broadcast %25 : vector<1x1x128xf32> to vector<1x16x128xf32>
    %27 = arith.addf %20, %26 : vector<1x16x128xf32>
    %c0_18 = arith.constant 0 : index
    %c0_19 = arith.constant 0 : index
    %c0_20 = arith.constant 0 : index
    %28 = vector.load %arg6[%c0_18, %c0_19, %c0_20] : memref<1x16x128xf32, #tpu.memory_space<vmem>>, vector<1x16x128xf32>
    tpu.vector_store %arg6[%c0_18, %c0_19, %c0_20], %27 {strides = array<i32>} : memref<1x16x128xf32, #tpu.memory_space<vmem>>, vector<1x16x128xf32>,
    %c0_21 = arith.constant 0 : index
    %c1_22 = arith.constant 1 : index
    %c0_23 = arith.constant 0 : index
    %29 = vector.load %arg6[%c0_21, %c1_22, %c0_23] : memref<1x16x128xf32, #tpu.memory_space<vmem>>, vector<1x15x128xf32>
    %30 = vector.extract_strided_slice %16 {offsets = [0, 0, 0], sizes = [1, 15, 128], strides = [1, 1, 1]} : vector<1x16x128xf32> to vector<1x15x128xf32>
    %31 = arith.addf %29, %30 : vector<1x15x128xf32>
    %c0_24 = arith.constant 0 : index
    %c1_25 = arith.constant 1 : index
    %c0_26 = arith.constant 0 : index
    %32 = vector.load %arg6[%c0_24, %c1_25, %c0_26] : memref<1x16x128xf32, #tpu.memory_space<vmem>>, vector<1x15x128xf32>
    tpu.vector_store %arg6[%c0_24, %c1_25, %c0_26], %31 {strides = array<i32>} : memref<1x16x128xf32, #tpu.memory_space<vmem>>, vector<1x15x128xf32>,
    %c0_27 = arith.constant 0 : index
    %c0_28 = arith.constant 0 : index
    %c0_29 = arith.constant 0 : index
    %33 = vector.load %arg6[%c0_27, %c0_28, %c0_29] : memref<1x16x128xf32, #tpu.memory_space<vmem>>, vector<1x15x128xf32>
    %34 = vector.extract_strided_slice %24 {offsets = [0, 1, 0], sizes = [1, 15, 128], strides = [1, 1, 1]} : vector<1x16x128xf32> to vector<1x15x128xf32>
    %35 = arith.addf %33, %34 : vector<1x15x128xf32>
    %c0_30 = arith.constant 0 : index
    %c0_31 = arith.constant 0 : index
    %c0_32 = arith.constant 0 : index
    %36 = vector.load %arg6[%c0_30, %c0_31, %c0_32] : memref<1x16x128xf32, #tpu.memory_space<vmem>>, vector<1x15x128xf32>
    tpu.vector_store %arg6[%c0_30, %c0_31, %c0_32], %35 {strides = array<i32>} : memref<1x16x128xf32, #tpu.memory_space<vmem>>, vector<1x15x128xf32>,
    %c0_33 = arith.constant 0 : index
    %c0_34 = arith.constant 0 : index
    %c0_35 = arith.constant 0 : index
    %37 = vector.load %arg6[%c0_33, %c0_34, %c0_35] : memref<1x16x128xf32, #tpu.memory_space<vmem>>, vector<1x16x128xf32>
    %38 = vector.shape_cast %37 : vector<1x16x128xf32> to vector<16x128xf32>
    %cst_36 = arith.constant dense<0.000000e+00> : vector<128xf32>
    %39 = vector.multi_reduction <add>, %38, %cst_36 [0] : vector<16x128xf32> to vector<128xf32>
    %40 = vector.shape_cast %39 : vector<128xf32> to vector<1x128xf32>
    %41 = arith.mulf %38, %38 : vector<16x128xf32>
    %cst_37 = arith.constant dense<0.000000e+00> : vector<128xf32>
    %42 = vector.multi_reduction <add>, %41, %cst_37 [0] : vector<16x128xf32> to vector<128xf32>
    %43 = vector.shape_cast %42 : vector<128xf32> to vector<1x128xf32>
    %44 = tpu.concatenate %40, %43 in 0 : vector<1x128xf32>, vector<1x128xf32> -> vector<2x128xf32>
    %c0_38 = arith.constant 0 : index
    %c0_39 = arith.constant 0 : index
    %c0_40 = arith.constant 0 : index
    %45 = vector.load %arg7[%c0_38, %c0_39, %c0_40] : memref<1x2x128xf32, #tpu.memory_space<vmem>>, vector<1x2x128xf32>
    %46 = vector.shape_cast %45 : vector<1x2x128xf32> to vector<2x128xf32>
    %47 = vector.shape_cast %44 : vector<2x128xf32> to vector<1x2x128xf32>
    tpu.vector_store %arg7[%c0_38, %c0_39, %c0_40], %47 {strides = array<i32>} : memref<1x2x128xf32, #tpu.memory_space<vmem>>, vector<1x2x128xf32>,
    return
  }
  func.func @transform_0(%arg0: i32) -> (i32, i32, i32) {
    %c0_i32 = arith.constant 0 : i32
    %c0_i32_0 = arith.constant 0 : i32
    %c0_i32_1 = arith.constant 0 : i32
    return %arg0, %c0_i32, %c0_i32_0 : i32, i32, i32
  }
  func.func @transform_1(%arg0: i32) -> (i32, i32) {
    %c0_i32 = arith.constant 0 : i32
    %c0_i32_0 = arith.constant 0 : i32
    %c0_i32_1 = arith.constant 0 : i32
    return %c0_i32, %c0_i32_0 : i32, i32
  }
  func.func @transform_2(%arg0: i32) -> (i32, i32) {
    %c0_i32 = arith.constant 0 : i32
    %c0_i32_0 = arith.constant 0 : i32
    %c0_i32_1 = arith.constant 0 : i32
    return %c0_i32, %c0_i32_0 : i32, i32
  }
  func.func @transform_3(%arg0: i32) -> (i32, i32, i32) {
    %c0_i32 = arith.constant 0 : i32
    %c0_i32_0 = arith.constant 0 : i32
    %c0_i32_1 = arith.constant 0 : i32
    %c0_i32_2 = arith.constant 0 : i32
    return %c0_i32, %c0_i32_0, %c0_i32_1 : i32, i32, i32
  }
  func.func @transform_4(%arg0: i32) -> (i32, i32) {
    %c0_i32 = arith.constant 0 : i32
    %c0_i32_0 = arith.constant 0 : i32
    %c0_i32_1 = arith.constant 0 : i32
    return %c0_i32, %c0_i32_0 : i32, i32
  }
  func.func @transform_5(%arg0: i32) -> (i32, i32, i32) {
    %c0_i32 = arith.constant 0 : i32
    %c0_i32_0 = arith.constant 0 : i32
    %c0_i32_1 = arith.constant 0 : i32
    return %arg0, %c0_i32, %c0_i32_0 : i32, i32, i32
  }
  func.func @transform_6(%arg0: i32) -> (i32, i32, i32) {
    %c0_i32 = arith.constant 0 : i32
    %c0_i32_0 = arith.constant 0 : i32
    %c0_i32_1 = arith.constant 0 : i32
    return %arg0, %c0_i32, %c0_i32_0 : i32, i32, i32
  }
}

</mosaic_0001>

<bundles_post_ra>
// kernel: double_conv.2
= control target key start
LH: loop header
LB: loop body
LE: loop exit
PB: predicated region body
PF: predicated region fallthrough
CT: control target
= control target key end

     0   :  { %s967_s15 = smov 0   ;;  %s1146_s0 = inlined_call_operand.vmem [shape: f32[2,16,128], index: 0, kind: input, shape index: {}]   ;;  %s1147_s1 = inlined_call_operand.vmem [shape: f32[3,128,128], index: 1, kind: input, shape index: {}]   ;;  %s1148_s2 = inlined_call_operand.vmem [shape: f32[1,128], index: 2, kind: input, shape index: {}]   ;;  %s1149_s3 = inlined_call_operand.vmem [shape: f32[2,16,128], index: 3, kind: output, shape index: {0}]   ;;  %s1150_s4 = inlined_call_operand.vmem [shape: f32[2,2,128], index: 4, kind: output, shape index: {1}]  }
   0x1 LB: > { %s624_s16 = sadd.s32 4294967295, %s940_s15   ;;  %p628_p0 = scmp.ge.s32.totalorder %s940_s15, 1  ;;  %s940_s15 = sphi %s967_s15, %s15_s15  }
   0x2   : > { %p165_p1 = scmp.lt.s32.totalorder %s940_s15, 3 }
   0x4   : > { %p166_p2 = pnand %p628_p0, %p165_p1 }
   0x5   : > { %v212_v0 = vld [vmem:[%s1147_s1] sm:$0xff] (!%p166_p2)  ;;  %v213_v1 = vld [vmem:[%s1147_s1 + $0x8] sm:$0xff] (!%p166_p2)  ;;  %p195_p3 = scmp.lt.s32.totalorder (!%p166_p2), %s624_s16, 1  ;;  %v214_v5 = vld [vmem:[%s1147_s1 + $0x10] sm:$0xff] (!%p166_p2)  ;;  %vm507_vm0 = vcmask (!%p166_p2), 1046528   ;;  %vm535_vm1 = vcmask (!%p166_p2), 1040384  }
   0x6   : > { %169 = sbr.rel (%p166_p2) target bundleno = 315 (0x13b), region = 32  ;;  %v634_v2 = vld [vmem:[%s1147_s1 + $0x80] sm:$0xff] (!%p166_p2)  ;;  %v830_v3 = vpack.c.bf16 (!%p166_p2), %v213_v1, %v212_v0  ;;  %v635_v4 = vld [vmem:[%s1147_s1 + $0x88] sm:$0xff] (!%p166_p2)  ;;  %v215_v6 = vld [vmem:[%s1147_s1 + $0x18] sm:$0xff] (!%p166_p2) }
   0x7   : > { %v862_v7 = vpack.c.bf16 (!%p166_p2), %v635_v4, %v634_v2  ;;  %v834_v8 = vpack.c.bf16 (!%p166_p2), %v215_v6, %v214_v5  ;;  %v636_v9 = vld [vmem:[%s1147_s1 + $0x90] sm:$0xff] (!%p166_p2)  ;;  %v637_v10 = vld [vmem:[%s1147_s1 + $0x98] sm:$0xff] (!%p166_p2)  ;;  %v216_v11 = vld [vmem:[%s1147_s1 + $0x20] sm:$0xff] (!%p166_p2) }
   0x8   : > { %831 = vmatprep.subr.bf16.mxu0 (!%p166_p2), %v830_v3  ;;  %v866_v12 = vpack.c.bf16 (!%p166_p2), %v637_v10, %v636_v9  ;;  %v217_v13 = vld [vmem:[%s1147_s1 + $0x28] sm:$0xff] (!%p166_p2)  ;;  %v638_v14 = vld [vmem:[%s1147_s1 + $0xa0] sm:$0xff] (!%p166_p2)  ;;  %v218_v18 = vld [vmem:[%s1147_s1 + $0x30] sm:$0xff] (!%p166_p2) }
   0x9   : > { %v639_v15 = vld [vmem:[%s1147_s1 + $0xa8] sm:$0xff] (!%p166_p2)  ;;  %863 = vmatprep.subr.bf16.mxu1 (!%p166_p2), %v862_v7  ;;  %833 = vmatpush3.bf16.msra.mxu0 (!%p166_p2), %v830_v3  ;;  %v838_v16 = vpack.c.bf16 (!%p166_p2), %v217_v13, %v216_v11  ;;  %v219_v19 = vld [vmem:[%s1147_s1 + $0x38] sm:$0xff] (!%p166_p2)  ;;  %v640_v20 = vld [vmem:[%s1147_s1 + $0xb0] sm:$0xff] (!%p166_p2) }
   0xa   : > { %865 = vmatpush3.bf16.msra.mxu1 (!%p166_p2), %v862_v7  ;;  %835 = vmatprep.subr.bf16.mxu0 (!%p166_p2), %v834_v8  ;;  %v870_v17 = vpack.c.bf16 (!%p166_p2), %v639_v15, %v638_v14  ;;  %v641_v21 = vld [vmem:[%s1147_s1 + $0xb8] sm:$0xff] (!%p166_p2)  ;;  %v842_v22 = vpack.c.bf16 (!%p166_p2), %v219_v19, %v218_v18  ;;  %v220_v24 = vld [vmem:[%s1147_s1 + $0x40] sm:$0xff] (!%p166_p2)  ;;  %v221_v25 = vld [vmem:[%s1147_s1 + $0x48] sm:$0xff] (!%p166_p2) }
   0xb   : > { %867 = vmatprep.subr.bf16.mxu1 (!%p166_p2), %v866_v12  ;;  %v874_v23 = vpack.c.bf16 (!%p166_p2), %v641_v21, %v640_v20  ;;  %v642_v27 = vld [vmem:[%s1147_s1 + $0xc0] sm:$0xff] (!%p166_p2)  ;;  %v643_v28 = vld [vmem:[%s1147_s1 + $0xc8] sm:$0xff] (!%p166_p2)  ;;  %v846_v29 = vpack.c.bf16 (!%p166_p2), %v221_v25, %v220_v24  ;;  %v222_v31 = vld [vmem:[%s1147_s1 + $0x50] sm:$0xff] (!%p166_p2) }
   0xc   : > { %v878_v30 = vpack.c.bf16 (!%p166_p2), %v643_v28, %v642_v27  ;;  %v223_v32 = vld [vmem:[%s1147_s1 + $0x58] sm:$0xff] (!%p166_p2)  ;;  %v644_v33 = vld [vmem:[%s1147_s1 + $0xd0] sm:$0xff] (!%p166_p2)  ;;  %v224_v37 = vld [vmem:[%s1147_s1 + $0x60] sm:$0xff] (!%p166_p2) }
   0xd   : > { %s1152_s16 = smov (!%p195_p3, %s624_s16), 1  ;;  %837 = vmatpush3.bf16.msra.mxu0 %v834_v8  ;;  %v645_v34 = vld [vmem:[%s1147_s1 + $0xd8] sm:$0xff]  ;;  %v850_v35 = vpack.c.bf16 %v223_v32, %v222_v31  ;;  %v225_v38 = vld [vmem:[%s1147_s1 + $0x68] sm:$0xff]  ;;  %v646_v39 = vld [vmem:[%s1147_s1 + $0xe0] sm:$0xff] }
   0xe   : > { %s669_s17 = sshll.u32 %s1152_s16, 4  ;;  %869 = vmatpush3.bf16.msra.mxu1 %v866_v12  ;;  %839 = vmatprep.subr.bf16.mxu0 %v838_v16  ;;  %v882_v36 = vpack.c.bf16 %v645_v34, %v644_v33  ;;  %v647_v40 = vld [vmem:[%s1147_s1 + $0xe8] sm:$0xff]  ;;  %v854_v41 = vpack.c.bf16 %v225_v38, %v224_v37  ;;  %v226_v43 = vld [vmem:[%s1147_s1 + $0x70] sm:$0xff]  ;;  %v227_v44 = vld [vmem:[%s1147_s1 + $0x78] sm:$0xff] }
   0xf   : > { %s1031_s28 = scalar_lea.vmem %s1146_s0, %s669_s17  ;;  %871 = vmatprep.subr.bf16.mxu1 %v870_v17  ;;  %v886_v42 = vpack.c.bf16 %v647_v40, %v646_v39  ;;  %v648_v45 = vld [vmem:[%s1147_s1 + $0xf0] sm:$0xff]  ;;  %v649_v46 = vld [vmem:[%s1147_s1 + $0xf8] sm:$0xff]  ;;  %v858_v47 = vpack.c.bf16 %v227_v44, %v226_v43  ;;  %v650_v49 = vld [vmem:[%s1147_s1 + $0x100] sm:$0xff]  ;;  %s204_s30 = scalar_lea.vmem %s1149_s3, %s669_s17 }
  0x10   : > { %v209_v26 = vld [vmem:[%s1031_s28] sm:$0xff]  ;;  %v890_v48 = vpack.c.bf16 %v649_v46, %v648_v45  ;;  %v651_v50 = vld [vmem:[%s1147_s1 + $0x108] sm:$0xff]  ;;  %v652_v52 = vld [vmem:[%s1147_s1 + $0x110] sm:$0xff]  ;;  %s633_s17 = sshll.u32 %s1152_s16, 1 }
  0x11   : > { %757 = vmatprep.mubr.f32.mxu0 %v209_v26  ;;  %792 = vmatprep.mubr.f32.mxu1 %v209_v26  ;;  %v894_v51 = vpack.c.bf16 %v651_v50, %v650_v49  ;;  %v653_v53 = vld [vmem:[%s1147_s1 + $0x118] sm:$0xff]  ;;  %v210_v54 = vld [vmem:[%s1031_s28 + $0x8] sm:$0xff]  ;;  %v654_v56 = vld [vmem:[%s1147_s1 + $0x120] sm:$0xff]  ;;  %s208_s6 = scalar_lea.vmem %s1150_s4, %s633_s17 }
  0x12   : > { %841 = vmatpush3.bf16.msra.mxu0 %v838_v16  ;;  %873 = vmatpush3.bf16.msra.mxu1 %v870_v17  ;;  %v898_v55 = vpack.c.bf16 %v653_v53, %v652_v52  ;;  %v655_v57 = vld [vmem:[%s1147_s1 + $0x128] sm:$0xff]  ;;  %v656_v59 = vld [vmem:[%s1147_s1 + $0x130] sm:$0xff]  ;;  %v657_v60 = vld [vmem:[%s1147_s1 + $0x138] sm:$0xff] }
  0x13   : > { %843 = vmatprep.subr.bf16.mxu0 %v842_v22  ;;  %875 = vmatprep.subr.bf16.mxu1 %v874_v23  ;;  %v902_v58 = vpack.c.bf16 %v655_v57, %v654_v56  ;;  %v906_v61 = vpack.c.bf16 %v657_v60, %v656_v59  ;;  %v658_v62 = vld [vmem:[%s1147_s1 + $0x140] sm:$0xff]  ;;  %v659_v63 = vld [vmem:[%s1147_s1 + $0x148] sm:$0xff]  ;;  %v660_v1 = vld [vmem:[%s1147_s1 + $0x150] sm:$0xff] }
  0x14   : > { %v910_v0 = vpack.c.bf16 %v659_v63, %v658_v62  ;;  %v661_v2 = vld [vmem:[%s1147_s1 + $0x158] sm:$0xff]  ;;  %v662_v4 = vld [vmem:[%s1147_s1 + $0x160] sm:$0xff]  ;;  %v663_v5 = vld [vmem:[%s1147_s1 + $0x168] sm:$0xff] }
  0x15   : > { %v914_v3 = vpack.c.bf16 %v661_v2, %v660_v1  ;;  %v918_v6 = vpack.c.bf16 %v663_v5, %v662_v4  ;;  %v664_v7 = vld [vmem:[%s1147_s1 + $0x170] sm:$0xff]  ;;  %v665_v8 = vld [vmem:[%s1147_s1 + $0x178] sm:$0xff]  ;;  %v666_v10 = vld [vmem:[%s1148_s2] ss:$0 sm:$0xff] }
  0x16   : > { %845 = vmatpush3.bf16.msra.mxu0 %v842_v22  ;;  %877 = vmatpush3.bf16.msra.mxu1 %v874_v23  ;;  %v922_v9 = vpack.c.bf16 %v665_v8, %v664_v7 }
  0x17   : > { %847 = vmatprep.subr.bf16.mxu0 %v846_v29  ;;  %879 = vmatprep.subr.bf16.mxu1 %v878_v30 }
  0x1a   : > { %849 = vmatpush3.bf16.msra.mxu0 %v846_v29  ;;  %881 = vmatpush3.bf16.msra.mxu1 %v878_v30 }
  0x1b   : > { %851 = vmatprep.subr.bf16.mxu0 %v850_v35  ;;  %883 = vmatprep.subr.bf16.mxu1 %v882_v36 }
  0x1e   : > { %853 = vmatpush3.bf16.msra.mxu0 %v850_v35  ;;  %885 = vmatpush3.bf16.msra.mxu1 %v882_v36 }
  0x1f   : > { %855 = vmatprep.subr.bf16.mxu0 %v854_v41  ;;  %887 = vmatprep.subr.bf16.mxu1 %v886_v42 }
  0x22   : > { %857 = vmatpush3.bf16.msra.mxu0 %v854_v41  ;;  %889 = vmatpush3.bf16.msra.mxu1 %v886_v42 }
  0x23   : > { %859 = vmatprep.subr.bf16.mxu0 %v858_v47  ;;  %891 = vmatprep.subr.bf16.mxu1 %v890_v48 }
  0x26   : > { %861 = vmatpush3.bf16.msra.mxu0 %v858_v47  ;;  %893 = vmatpush3.bf16.msra.mxu1 %v890_v48 }
  0x27   : > { %895 = vmatprep.subr.bf16.mxu0 %v894_v51 }
  0x29   : > { %758 = vmatmul.mubr.f32.vlgmr.msra.gmra.mrb[0].mxu0 %v210_v54  ;;  %793 = vmatmul.mubr.f32.vlgmr.msra.gmra.mrb[0].mxu1 %v210_v54 }
  0x2a   : > { %897 = vmatpush3.bf16.msra.mxu0 %v894_v51  ;;  %827 = vmatprep.mubr.f32.mxu0 %v209_v26 }
  0x2b   : > { %899 = vmatprep.subr.bf16.mxu0 %v898_v55 }
  0x2e   : > { %901 = vmatpush3.bf16.msra.mxu0 %v898_v55 }
  0x2f   : > { %903 = vmatprep.subr.bf16.mxu0 %v902_v58 }
  0x32   : > { %905 = vmatpush3.bf16.msra.mxu0 %v902_v58 }
  0x33   : > { %907 = vmatprep.subr.bf16.mxu0 %v906_v61 }
  0x36   : > { %909 = vmatpush3.bf16.msra.mxu0 %v906_v61 }
  0x37   : > { %911 = vmatprep.subr.bf16.mxu0 %v910_v0 }
  0x3a   : > { %913 = vmatpush3.bf16.msra.mxu0 %v910_v0 }
  0x3b   : > { %915 = vmatprep.subr.bf16.mxu0 %v914_v3 }
  0x3e   : > { %917 = vmatpush3.bf16.msra.mxu0 %v914_v3 }
  0x3f   : > { %919 = vmatprep.subr.bf16.mxu0 %v918_v6 }
  0x42   : > { %921 = vmatpush3.bf16.msra.mxu0 %v918_v6 }
  0x43   : > { %923 = vmatprep.subr.bf16.mxu0 %v922_v9 }
  0x46   : > { %925 = vmatpush3.bf16.msra.mxu0 %v922_v9 }
  0x49   : > { %828 = vmatmul.mubr.f32.vlgmr.msra.gmra.mrb[2].mxu0 %v210_v54 }
  0xfc   : > { %v759_v11 = vpop.f32.mrb[0].mxu0  ;;  %v794_v12 = vpop.f32.mrb[0].mxu1 }
  0xfd   : > { %v294_v13 = vpop.f32.mrb[1].mxu0  ;;  %v494_v14 = vadd.f32 %v794_v12, %v666_v10  ;;  %v386_v15 = vpop.f32.mrb[1].mxu1 }
  0xfe   : > { %v493_v16 = vadd.f32 %v666_v10, %v386_v15 }
  0xff   : > { %496 = vst [vmem:[%s204_s30 + $0x8] sm:$0xff] %v494_v14 }
 0x100   : > { %495 = vst [vmem:[%s204_s30] sm:$0xff] %v493_v16 }
 0x106   : > { %v498_v17 = vld [vmem:[%s204_s30 + $0x9] sm:$0x7f] }
 0x107   : > { %v500_v18 = vadd.f32 %v759_v11, %v498_v17  ;;  %v497_v19 = vld [vmem:[%s204_s30 + $0x1] sm:$0xff] }
 0x108   : > { %v499_v20 = vadd.f32 %v497_v19, %v294_v13 }
 0x109   : > { %502 = vst [vmem:[%s204_s30 + $0x9] sm:$0x7f] %v500_v18 }
 0x10a   : > { %501 = vst [vmem:[%s204_s30 + $0x1] sm:$0xff] %v499_v20 }
 0x111   : > { %v504_v24 = vld [vmem:[%s204_s30 + $0x8] sm:$0x7f]  ;;  %v503_v27 = vld [vmem:[%s204_s30] sm:$0xff] }
 0x11c   : > { %v829_v21 = vpop.f32.mrb[2].mxu0 }
 0x11d   : > { %v509_v22 = vrot.slane %v829_v21, 1  ;;  %v478_v23 = vpop.f32.mrb[3].mxu0 }
 0x11e   : > { %v508_v25 = vrot.slane %v478_v23, 1 }
 0x11f   : > { %v514_v26 = vadd.f32 %v509_v22, %v504_v24 }
 0x120   : > { %v510_v28 = vsel %vm507_vm0, %v508_v25, %v509_v22 }
 0x121   : > { %516 = vst [vmem:[%s204_s30 + $0x8] sm:$0x7f] %v514_v26  ;;  %v513_v29 = vadd.f32 %v510_v28, %v503_v27 }
 0x123   : > { %515 = vst [vmem:[%s204_s30] sm:$0xff] %v513_v29  ;;  %v526_v33 = vmul.f32 %v513_v29, %v513_v29 }
 0x128   : > { %v518_v30 = vld [vmem:[%s204_s30 + $0x8] sm:$0xff] }
 0x129   : > { %v527_v31 = vmul.f32 %v518_v30, %v518_v30  ;;  %v519_v32 = vadd.f32 %v518_v30, %v513_v29 }
 0x12b   : > { %v520_v34 = vrot.slane %v519_v32, 4  ;;  %v528_v35 = vadd.f32 %v527_v31, %v526_v33 }
 0x12d   : > { %v521_v36 = vadd.f32 %v520_v34, %v519_v32  ;;  %v529_v37 = vrot.slane %v528_v35, 4 }
 0x12f   : > { %v522_v38 = vrot.slane %v521_v36, 2  ;;  %v530_v39 = vadd.f32 %v529_v37, %v528_v35 }
 0x131   : > { %v523_v40 = vadd.f32 %v522_v38, %v521_v36  ;;  %v531_v41 = vrot.slane %v530_v39, 2 }
 0x133   : > { %v524_v42 = vrot.slane %v523_v40, 1  ;;  %v532_v43 = vadd.f32 %v531_v41, %v530_v39 }
 0x135   : > { %v533_v44 = vrot.slane %v532_v43, 1  ;;  %v525_v45 = vadd.f32 %v524_v42, %v523_v40 }
 0x137   : > { %v534_v46 = vadd.f32 %v533_v44, %v532_v43 }
 0x139   : > { %v536_v47 = vsel %vm535_vm1, %v525_v45, %v534_v46 }
 0x13a   : > { %537 = vst [vmem:[%s208_s6] sm:$0x3] %v536_v47 }
 0x13b PF: > { %s15_s15 = sadd.s32 1, %s940_s15  }
 0x13c   : > { %p12_p4 = scmp.ge.s32.totalorder %s15_s15, 4  }
 0x13e   :  { %14 = sbr.rel (!%p12_p4) target bundleno = 1 (0x1), region = 76 }

// kernel: double_conv.3
= control target key start
LH: loop header
LB: loop body
LE: loop exit
PB: predicated region body
PF: predicated region fallthrough
CT: control target
= control target key end

     0   :  { %s1053_s21 = smov 0   ;;  %s1238_s0 = inlined_call_operand.vmem [shape: f32[2,16,128], index: 0, kind: input, shape index: {}]   ;;  %s1239_s1 = inlined_call_operand.vmem [shape: f32[1,128], index: 1, kind: input, shape index: {}]   ;;  %s1240_s2 = inlined_call_operand.vmem [shape: f32[1,128], index: 2, kind: input, shape index: {}]   ;;  %s1241_s3 = inlined_call_operand.vmem [shape: f32[3,128,128], index: 3, kind: input, shape index: {}]   ;;  %s1242_s4 = inlined_call_operand.vmem [shape: f32[1,128], index: 4, kind: input, shape index: {}]   ;;  %s1243_s5 = inlined_call_operand.vmem [shape: f32[2,16,128], index: 5, kind: output, shape index: {0}]   ;;  %s1244_s6 = inlined_call_operand.vmem [shape: f32[2,2,128], index: 6, kind: output, shape index: {1}]  }
   0x1 LB: > { %s698_s22 = sadd.s32 4294967295, %s1016_s21   ;;  %p702_p0 = scmp.ge.s32.totalorder %s1016_s21, 1  ;;  %s1016_s21 = sphi %s1053_s21, %s17_s21  }
   0x2   : > { %p215_p1 = scmp.lt.s32.totalorder %s1016_s21, 3 }
   0x4   : > { %p216_p2 = pnand %p702_p0, %p215_p1 }
   0x5   : > { %v286_v0 = vld [vmem:[%s1241_s3] sm:$0xff] (!%p216_p2)  ;;  %v287_v1 = vld [vmem:[%s1241_s3 + $0x8] sm:$0xff] (!%p216_p2)  ;;  %p249_p3 = scmp.lt.s32.totalorder (!%p216_p2), %s698_s22, 1  ;;  %v288_v5 = vld [vmem:[%s1241_s3 + $0x10] sm:$0xff] (!%p216_p2)  ;;  %vm581_vm0 = vcmask (!%p216_p2), 1046528   ;;  %vm609_vm1 = vcmask (!%p216_p2), 1040384  }
   0x6   : > { %219 = sbr.rel (%p216_p2) target bundleno = 314 (0x13a), region = 40  ;;  %v710_v2 = vld [vmem:[%s1241_s3 + $0x80] sm:$0xff] (!%p216_p2)  ;;  %v906_v3 = vpack.c.bf16 (!%p216_p2), %v287_v1, %v286_v0  ;;  %v711_v4 = vld [vmem:[%s1241_s3 + $0x88] sm:$0xff] (!%p216_p2)  ;;  %v289_v6 = vld [vmem:[%s1241_s3 + $0x18] sm:$0xff] (!%p216_p2) }
   0x7   : > { %v938_v7 = vpack.c.bf16 (!%p216_p2), %v711_v4, %v710_v2  ;;  %v910_v8 = vpack.c.bf16 (!%p216_p2), %v289_v6, %v288_v5  ;;  %v712_v9 = vld [vmem:[%s1241_s3 + $0x90] sm:$0xff] (!%p216_p2)  ;;  %v713_v10 = vld [vmem:[%s1241_s3 + $0x98] sm:$0xff] (!%p216_p2)  ;;  %v290_v11 = vld [vmem:[%s1241_s3 + $0x20] sm:$0xff] (!%p216_p2) }
   0x8   : > { %907 = vmatprep.subr.bf16.mxu0 (!%p216_p2), %v906_v3  ;;  %v942_v12 = vpack.c.bf16 (!%p216_p2), %v713_v10, %v712_v9  ;;  %v291_v13 = vld [vmem:[%s1241_s3 + $0x28] sm:$0xff] (!%p216_p2)  ;;  %v714_v14 = vld [vmem:[%s1241_s3 + $0xa0] sm:$0xff] (!%p216_p2)  ;;  %v292_v18 = vld [vmem:[%s1241_s3 + $0x30] sm:$0xff] (!%p216_p2) }
   0x9   : > { %v715_v15 = vld [vmem:[%s1241_s3 + $0xa8] sm:$0xff] (!%p216_p2)  ;;  %939 = vmatprep.subr.bf16.mxu1 (!%p216_p2), %v938_v7  ;;  %909 = vmatpush3.bf16.msra.mxu0 (!%p216_p2), %v906_v3  ;;  %v914_v16 = vpack.c.bf16 (!%p216_p2), %v291_v13, %v290_v11  ;;  %v293_v19 = vld [vmem:[%s1241_s3 + $0x38] sm:$0xff] (!%p216_p2)  ;;  %v716_v20 = vld [vmem:[%s1241_s3 + $0xb0] sm:$0xff] (!%p216_p2) }
   0xa   : > { %941 = vmatpush3.bf16.msra.mxu1 (!%p216_p2), %v938_v7  ;;  %911 = vmatprep.subr.bf16.mxu0 (!%p216_p2), %v910_v8  ;;  %v946_v17 = vpack.c.bf16 (!%p216_p2), %v715_v15, %v714_v14  ;;  %v717_v21 = vld [vmem:[%s1241_s3 + $0xb8] sm:$0xff] (!%p216_p2)  ;;  %v918_v22 = vpack.c.bf16 (!%p216_p2), %v293_v19, %v292_v18  ;;  %v294_v23 = vld [vmem:[%s1241_s3 + $0x40] sm:$0xff] (!%p216_p2)  ;;  %v295_v25 = vld [vmem:[%s1241_s3 + $0x48] sm:$0xff] (!%p216_p2) }
   0xb   : > { %943 = vmatprep.subr.bf16.mxu1 (!%p216_p2), %v942_v12  ;;  %v950_v24 = vpack.c.bf16 (!%p216_p2), %v717_v21, %v716_v20  ;;  %v718_v26 = vld [vmem:[%s1241_s3 + $0xc0] sm:$0xff] (!%p216_p2)  ;;  %v719_v28 = vld [vmem:[%s1241_s3 + $0xc8] sm:$0xff] (!%p216_p2)  ;;  %v922_v32 = vpack.c.bf16 (!%p216_p2), %v295_v25, %v294_v23  ;;  %v296_v34 = vld [vmem:[%s1241_s3 + $0x50] sm:$0xff] (!%p216_p2) }
   0xc   : > { %v708_v29 = vld [vmem:[%s1239_s1] ss:$0 sm:$0xff] (!%p216_p2)  ;;  %v954_v33 = vpack.c.bf16 (!%p216_p2), %v719_v28, %v718_v26  ;;  %v297_v35 = vld [vmem:[%s1241_s3 + $0x58] sm:$0xff] (!%p216_p2)  ;;  %v720_v37 = vld [vmem:[%s1241_s3 + $0xd0] sm:$0xff] (!%p216_p2) }
   0xd   : > { %s1246_s22 = smov (!%p249_p3, %s698_s22), 1  ;;  %913 = vmatpush3.bf16.msra.mxu0 %v910_v8  ;;  %v709_v30 = vld [vmem:[%s1240_s2] ss:$0 sm:$0xff]  ;;  %v721_v38 = vld [vmem:[%s1241_s3 + $0xd8] sm:$0xff]  ;;  %v926_v40 = vpack.c.bf16 %v297_v35, %v296_v34  ;;  %v299_v43 = vld [vmem:[%s1241_s3 + $0x68] sm:$0xff] }
   0xe   : > { %s745_s25 = sshll.u32 %s1246_s22, 4  ;;  %945 = vmatpush3.bf16.msra.mxu1 %v942_v12  ;;  %915 = vmatprep.subr.bf16.mxu0 %v914_v16  ;;  %v958_v41 = vpack.c.bf16 %v721_v38, %v720_v37  ;;  %v298_v42 = vld [vmem:[%s1241_s3 + $0x60] sm:$0xff]  ;;  %v723_v45 = vld [vmem:[%s1241_s3 + $0xe8] sm:$0xff]  ;;  %v300_v49 = vld [vmem:[%s1241_s3 + $0x70] sm:$0xff] }
   0xf   : > { %s1117_s12 = scalar_lea.vmem %s1238_s0, %s745_s25  ;;  %947 = vmatprep.subr.bf16.mxu1 %v946_v17  ;;  %v722_v44 = vld [vmem:[%s1241_s3 + $0xe0] sm:$0xff]  ;;  %v930_v47 = vpack.c.bf16 %v299_v43, %v298_v42  ;;  %v301_v50 = vld [vmem:[%s1241_s3 + $0x78] sm:$0xff]  ;;  %v724_v51 = vld [vmem:[%s1241_s3 + $0xf0] sm:$0xff]  ;;  %s258_s26 = scalar_lea.vmem %s1243_s5, %s745_s25 }
  0x10   : > { %v263_v27 = vld [vmem:[%s1117_s12] sm:$0xff]  ;;  %v264_v46 = vld [vmem:[%s1117_s12 + $0x8] sm:$0xff]  ;;  %v962_v48 = vpack.c.bf16 %v723_v45, %v722_v44  ;;  %v725_v52 = vld [vmem:[%s1241_s3 + $0xf8] sm:$0xff]  ;;  %v934_v54 = vpack.c.bf16 %v301_v50, %v300_v49  ;;  %s707_s25 = sshll.u32 %s1246_s22, 1 }
  0x11   : > { %917 = vmatpush3.bf16.msra.mxu0 %v914_v16  ;;  %v272_v31 = vmul.f32 %v708_v29, %v263_v27  ;;  %v273_v53 = vmul.f32 %v708_v29, %v264_v46  ;;  %v966_v55 = vpack.c.bf16 %v725_v52, %v724_v51  ;;  %v726_v56 = vld [vmem:[%s1241_s3 + $0x100] sm:$0xff]  ;;  %v727_v57 = vld [vmem:[%s1241_s3 + $0x108] sm:$0xff]  ;;  %v728_v60 = vld [vmem:[%s1241_s3 + $0x110] sm:$0xff]  ;;  %s262_s29 = scalar_lea.vmem %s1244_s6, %s707_s25 }
  0x12   : > { %949 = vmatpush3.bf16.msra.mxu1 %v946_v17  ;;  %919 = vmatprep.subr.bf16.mxu0 %v918_v22  ;;  %v970_v59 = vpack.c.bf16 %v727_v57, %v726_v56  ;;  %v729_v61 = vld [vmem:[%s1241_s3 + $0x118] sm:$0xff]  ;;  %v730_v0 = vld [vmem:[%s1241_s3 + $0x120] sm:$0xff]  ;;  %v731_v1 = vld [vmem:[%s1241_s3 + $0x128] sm:$0xff] }
  0x13   : > { %951 = vmatprep.subr.bf16.mxu1 %v950_v24  ;;  %v281_v36 = vadd.f32 %v709_v30, %v272_v31  ;;  %v282_v58 = vadd.f32 %v709_v30, %v273_v53  ;;  %v974_v63 = vpack.c.bf16 %v729_v61, %v728_v60  ;;  %v978_v2 = vpack.c.bf16 %v731_v1, %v730_v0  ;;  %v732_v3 = vld [vmem:[%s1241_s3 + $0x130] sm:$0xff]  ;;  %v733_v4 = vld [vmem:[%s1241_s3 + $0x138] sm:$0xff]  ;;  %v734_v6 = vld [vmem:[%s1241_s3 + $0x140] sm:$0xff] }
  0x14   : > { %v982_v5 = vpack.c.bf16 %v733_v4, %v732_v3  ;;  %v735_v7 = vld [vmem:[%s1241_s3 + $0x148] sm:$0xff]  ;;  %v736_v9 = vld [vmem:[%s1241_s3 + $0x150] sm:$0xff]  ;;  %v737_v10 = vld [vmem:[%s1241_s3 + $0x158] sm:$0xff] }
  0x15   : > { %921 = vmatpush3.bf16.msra.mxu0 %v918_v22  ;;  %v283_v39 = vmax.f32 %v281_v36, 0.0  ;;  %v284_v62 = vmax.f32 %v282_v58, 0.0  ;;  %v986_v8 = vpack.c.bf16 %v735_v7, %v734_v6  ;;  %v990_v11 = vpack.c.bf16 %v737_v10, %v736_v9  ;;  %v738_v12 = vld [vmem:[%s1241_s3 + $0x160] sm:$0xff]  ;;  %v739_v13 = vld [vmem:[%s1241_s3 + $0x168] sm:$0xff]  ;;  %v740_v15 = vld [vmem:[%s1241_s3 + $0x170] sm:$0xff] }
  0x16   : > { %953 = vmatpush3.bf16.msra.mxu1 %v950_v24  ;;  %923 = vmatprep.subr.bf16.mxu0 %v922_v32  ;;  %v994_v14 = vpack.c.bf16 %v739_v13, %v738_v12  ;;  %v741_v16 = vld [vmem:[%s1241_s3 + $0x178] sm:$0xff]  ;;  %v742_v18 = vld [vmem:[%s1242_s4] ss:$0 sm:$0xff] }
  0x17   : > { %955 = vmatprep.subr.bf16.mxu1 %v954_v33  ;;  %833 = vmatprep.mubr.f32.mxu0 %v283_v39  ;;  %v998_v17 = vpack.c.bf16 %v741_v16, %v740_v15 }
  0x18   : > { %868 = vmatprep.mubr.f32.mxu1 %v283_v39 }
  0x19   : > { %925 = vmatpush3.bf16.msra.mxu0 %v922_v32 }
  0x1a   : > { %957 = vmatpush3.bf16.msra.mxu1 %v954_v33  ;;  %927 = vmatprep.subr.bf16.mxu0 %v926_v40 }
  0x1b   : > { %959 = vmatprep.subr.bf16.mxu1 %v958_v41 }
  0x1d   : > { %929 = vmatpush3.bf16.msra.mxu0 %v926_v40 }
  0x1e   : > { %961 = vmatpush3.bf16.msra.mxu1 %v958_v41  ;;  %931 = vmatprep.subr.bf16.mxu0 %v930_v47 }
  0x1f   : > { %963 = vmatprep.subr.bf16.mxu1 %v962_v48 }
  0x21   : > { %933 = vmatpush3.bf16.msra.mxu0 %v930_v47 }
  0x22   : > { %965 = vmatpush3.bf16.msra.mxu1 %v962_v48  ;;  %935 = vmatprep.subr.bf16.mxu0 %v934_v54 }
  0x23   : > { %967 = vmatprep.subr.bf16.mxu1 %v966_v55 }
  0x25   : > { %937 = vmatpush3.bf16.msra.mxu0 %v934_v54 }
  0x26   : > { %969 = vmatpush3.bf16.msra.mxu1 %v966_v55  ;;  %971 = vmatprep.subr.bf16.mxu0 %v970_v59 }
  0x28   : > { %834 = vmatmul.mubr.f32.vlgmr.msra.gmra.mrb[0].mxu0 %v284_v62 }
  0x29   : > { %869 = vmatmul.mubr.f32.vlgmr.msra.gmra.mrb[0].mxu1 %v284_v62  ;;  %973 = vmatpush3.bf16.msra.mxu0 %v970_v59 }
  0x2a   : > { %975 = vmatprep.subr.bf16.mxu0 %v974_v63  ;;  %903 = vmatprep.mubr.f32.mxu0 %v283_v39 }
  0x2d   : > { %977 = vmatpush3.bf16.msra.mxu0 %v974_v63 }
  0x2e   : > { %979 = vmatprep.subr.bf16.mxu0 %v978_v2 }
  0x31   : > { %981 = vmatpush3.bf16.msra.mxu0 %v978_v2 }
  0x32   : > { %983 = vmatprep.subr.bf16.mxu0 %v982_v5 }
  0x35   : > { %985 = vmatpush3.bf16.msra.mxu0 %v982_v5 }
  0x36   : > { %987 = vmatprep.subr.bf16.mxu0 %v986_v8 }
  0x39   : > { %989 = vmatpush3.bf16.msra.mxu0 %v986_v8 }
  0x3a   : > { %991 = vmatprep.subr.bf16.mxu0 %v990_v11 }
  0x3d   : > { %993 = vmatpush3.bf16.msra.mxu0 %v990_v11 }
  0x3e   : > { %995 = vmatprep.subr.bf16.mxu0 %v994_v14 }
  0x41   : > { %997 = vmatpush3.bf16.msra.mxu0 %v994_v14 }
  0x42   : > { %999 = vmatprep.subr.bf16.mxu0 %v998_v17 }
  0x45   : > { %1001 = vmatpush3.bf16.msra.mxu0 %v998_v17 }
  0x48   : > { %904 = vmatmul.mubr.f32.vlgmr.msra.gmra.mrb[2].mxu0 %v284_v62 }
  0xfb   : > { %v835_v19 = vpop.f32.mrb[0].mxu0 }
  0xfc   : > { %v870_v20 = vpop.f32.mrb[0].mxu1  ;;  %v368_v21 = vpop.f32.mrb[1].mxu0 }
  0xfd   : > { %v568_v22 = vadd.f32 %v870_v20, %v742_v18  ;;  %v460_v23 = vpop.f32.mrb[1].mxu1 }
  0xfe   : > { %v567_v24 = vadd.f32 %v742_v18, %v460_v23 }
  0xff   : > { %570 = vst [vmem:[%s258_s26 + $0x8] sm:$0xff] %v568_v22 }
 0x100   : > { %569 = vst [vmem:[%s258_s26] sm:$0xff] %v567_v24 }
 0x106   : > { %v572_v25 = vld [vmem:[%s258_s26 + $0x9] sm:$0x7f] }
 0x107   : > { %v574_v26 = vadd.f32 %v835_v19, %v572_v25  ;;  %v571_v27 = vld [vmem:[%s258_s26 + $0x1] sm:$0xff] }
 0x108   : > { %v573_v28 = vadd.f32 %v571_v27, %v368_v21 }
 0x109   : > { %576 = vst [vmem:[%s258_s26 + $0x9] sm:$0x7f] %v574_v26 }
 0x10a   : > { %575 = vst [vmem:[%s258_s26 + $0x1] sm:$0xff] %v573_v28 }
 0x111   : > { %v578_v32 = vld [vmem:[%s258_s26 + $0x8] sm:$0x7f]  ;;  %v577_v35 = vld [vmem:[%s258_s26] sm:$0xff] }
 0x11b   : > { %v905_v29 = vpop.f32.mrb[2].mxu0 }
 0x11c   : > { %v583_v30 = vrot.slane %v905_v29, 1  ;;  %v552_v31 = vpop.f32.mrb[3].mxu0 }
 0x11d   : > { %v582_v33 = vrot.slane %v552_v31, 1 }
 0x11e   : > { %v588_v34 = vadd.f32 %v583_v30, %v578_v32 }
 0x11f   : > { %v584_v36 = vsel %vm581_vm0, %v582_v33, %v583_v30 }
 0x120   : > { %590 = vst [vmem:[%s258_s26 + $0x8] sm:$0x7f] %v588_v34  ;;  %v587_v37 = vadd.f32 %v584_v36, %v577_v35 }
 0x122   : > { %589 = vst [vmem:[%s258_s26] sm:$0xff] %v587_v37  ;;  %v600_v41 = vmul.f32 %v587_v37, %v587_v37 }
 0x127   : > { %v592_v38 = vld [vmem:[%s258_s26 + $0x8] sm:$0xff] }
 0x128   : > { %v601_v39 = vmul.f32 %v592_v38, %v592_v38  ;;  %v593_v40 = vadd.f32 %v592_v38, %v587_v37 }
 0x12a   : > { %v594_v42 = vrot.slane %v593_v40, 4  ;;  %v602_v43 = vadd.f32 %v601_v39, %v600_v41 }
 0x12c   : > { %v595_v44 = vadd.f32 %v594_v42, %v593_v40  ;;  %v603_v45 = vrot.slane %v602_v43, 4 }
 0x12e   : > { %v596_v46 = vrot.slane %v595_v44, 2  ;;  %v604_v47 = vadd.f32 %v603_v45, %v602_v43 }
 0x130   : > { %v597_v48 = vadd.f32 %v596_v46, %v595_v44  ;;  %v605_v49 = vrot.slane %v604_v47, 2 }
 0x132   : > { %v598_v50 = vrot.slane %v597_v48, 1  ;;  %v606_v51 = vadd.f32 %v605_v49, %v604_v47 }
 0x134   : > { %v607_v52 = vrot.slane %v606_v51, 1  ;;  %v599_v53 = vadd.f32 %v598_v50, %v597_v48 }
 0x136   : > { %v608_v54 = vadd.f32 %v607_v52, %v606_v51 }
 0x138   : > { %v610_v55 = vsel %vm609_vm1, %v599_v53, %v608_v54 }
 0x139   : > { %611 = vst [vmem:[%s262_s29] sm:$0x3] %v610_v55 }
 0x13a PF: > { %s17_s21 = sadd.s32 1, %s1016_s21  }
 0x13b   : > { %p14_p4 = scmp.ge.s32.totalorder %s17_s21, 4  }
 0x13d   :  { %16 = sbr.rel (!%p14_p4) target bundleno = 1 (0x1), region = 84 }

</bundles_post_ra>
